<compile_context>
chip_gen: v5e
topology: v5e:2x2
jax: 0.10.0
libtpu: 0.0.40
codegen_flags: <defaults>
</compile_context>

<pallas_src>
import jax
import jax.numpy as jnp
from jax.experimental import pallas as pl
from jax.experimental.pallas import tpu as pltpu

LANE = 128
SUBLANE = 8
NEG_BIAS = -1e30  # f32-only: exp(NEG_BIAS - max) underflows cleanly to 0.0


def _round_up(n, m):
    return ((n + m - 1) // m) * m


# --------------------------------------------------------------------------- #
# Kernel
# --------------------------------------------------------------------------- #
def mlp_kernel(x_ref, w1_ref, b1_ref, w2_ref, b2_ref, out_ref):
    # ---- layer 1: x @ W1 + b1, sigmoid (hidden padded to 128 lanes) ----
    h = jnp.dot(x_ref[...], w1_ref[...], preferred_element_type=jnp.float32)
    h = jax.nn.sigmoid(h + b1_ref[...])                     # (TB, H_pad)

    # ---- layer 2: (TB,128) @ (128,128); padded W2 rows are zero, padded
    #      output columns carry a -1e30 bias so softmax ignores them ----
    logits = jnp.dot(h, w2_ref[...], preferred_element_type=jnp.float32)
    logits = logits + b2_ref[...]                            # (TB, O_pad)

    # ---- numerically stable softmax over the last (lane-dense) axis ----
    m = jnp.max(logits, axis=-1, keepdims=True)
    e = jnp.exp(logits - m)                                  # padded lanes -> 0
    denom = jnp.sum(e, axis=-1, keepdims=True)
    inv = pl.reciprocal(denom, approx=True)                  # EUP vrcp (free slot)
    inv = inv * (2.0 - denom * inv)                          # one NR step -> ~f32-exact
    probs = e * inv

    # ---- store only the real output columns (masked store, 12 B/row) ----
    o = out_ref.shape[-1]
    out_ref[...] = probs[:, :o].astype(out_ref.dtype)


# --------------------------------------------------------------------------- #
# Parameter preparation (run once, outside the hot path)
# --------------------------------------------------------------------------- #
def prepare_params(w1, b1, w2, b2):
    """Pad weights once:
      * hidden dim  H -> multiple of 128 (zero W1 cols / b1 / W2 rows)
      * output dim  O -> multiple of 128 inside the kernel, padded columns get
        a -1e30 bias so they vanish in the softmax (f32 only).
    """
    d_in, h = w1.shape
    o = w2.shape[1]
    h_pad = _round_up(h, LANE)
    o_pad = _round_up(o, LANE)
    w1_p = jnp.zeros((d_in, h_pad), jnp.float32).at[:, :h].set(w1)
    b1_p = jnp.zeros((1, h_pad), jnp.float32).at[0, :h].set(b1)
    w2_p = jnp.zeros((h_pad, o_pad), jnp.float32).at[:h, :o].set(w2)
    b2_p = jnp.full((1, o_pad), NEG_BIAS, dtype=jnp.float32).at[0, :o].set(b2)
    return (w1_p, b1_p, w2_p, b2_p), o


def _pick_tile(B):
    """Large tiles (grid-step overhead ~0.35 us dominates small shapes).
    Single block for small batches; >=2 steps at large B so v7x can shard the
    'parallel' batch axis across both TensorCores."""
    b8 = _round_up(B, SUBLANE)
    if b8 <= 1024:
        return b8, b8                      # one block, no x padding
    for tb in (2048, 1024, 512):
        if b8 % tb == 0:
            return tb, b8                  # divides evenly -> no x padding
    tb = 1024
    return tb, _round_up(b8, tb)


# --------------------------------------------------------------------------- #
# Forward
# --------------------------------------------------------------------------- #
def mlp_forward_padded(x, padded_params, output_size, *, tb=None):
    """x: (B, D_in) f32; padded_params from prepare_params."""
    w1_p, b1_p, w2_p, b2_p = padded_params
    B, d_in = x.shape
    h_pad = w1_p.shape[1]
    o_pad = w2_p.shape[1]

    if tb is None:
        tb, b_pad = _pick_tile(B)
    else:
        tb = max(SUBLANE, _round_up(min(int(tb), _round_up(B, SUBLANE)), SUBLANE))
        b_pad = _round_up(B, tb)

    if b_pad != B:  # only hit when tb does not divide B
        x = jnp.pad(x, ((0, b_pad - B), (0, 0)))

    grid = (b_pad // tb,)

    out = pl.pallas_call(
        mlp_kernel,
        out_shape=jax.ShapeDtypeStruct((b_pad, output_size), jnp.float32),
        grid=grid,
        in_specs=[
            pl.BlockSpec((tb, d_in), lambda i: (i, 0)),      # x tiles stream in
            pl.BlockSpec((d_in, h_pad), lambda i: (0, 0)),   # weights VMEM-resident
            pl.BlockSpec((1, h_pad), lambda i: (0, 0)),
            pl.BlockSpec((h_pad, o_pad), lambda i: (0, 0)),
            pl.BlockSpec((1, o_pad), lambda i: (0, 0)),
        ],
        out_specs=pl.BlockSpec((tb, output_size), lambda i: (i, 0)),
        compiler_params=pltpu.CompilerParams(
            dimension_semantics=("parallel",)),
    )(x, w1_p, b1_p, w2_p, b2_p)

    return out if b_pad == B else out[:B]


def make_mlp(w1, b1, w2, b2):
    """Pad the params once and return a jitted forward(x) closure."""
    padded, o = prepare_params(w1, b1, w2, b2)

    @jax.jit
    def forward(x):
        return mlp_forward_padded(x, padded, o)

    return forward


# --------------------------------------------------------------------------- #
# Init (mimics PyTorch nn.Linear default U(-1/sqrt(fan_in), +1/sqrt(fan_in)))
# --------------------------------------------------------------------------- #
def init_params(key, input_size, hidden_size, output_size):
    k1, k2, k3, k4 = jax.random.split(key, 4)
    bound1 = 1.0 / jnp.sqrt(input_size)
    bound2 = 1.0 / jnp.sqrt(hidden_size)
    # Stored pre-transposed as (in, out) so the kernel does x @ W directly.
    w1 = jax.random.uniform(k1, (input_size, hidden_size), jnp.float32, -bound1, bound1)
    b1 = jax.random.uniform(k2, (hidden_size,), jnp.float32, -bound1, bound1)
    w2 = jax.random.uniform(k3, (hidden_size, output_size), jnp.float32, -bound2, bound2)
    b2 = jax.random.uniform(k4, (output_size,), jnp.float32, -bound2, bound2)
    return w1, b1, w2, b2


if __name__ == "__main__":
    # Iris-like shapes implied by the module: input_size=4, hidden=16, output=3.
    batch, input_size, hidden_size, output_size = 64, 4, 16, 3

    key = jax.random.PRNGKey(0)
    kx, kp = jax.random.split(key)
    x = jax.random.normal(kx, (batch, input_size), dtype=jnp.float32)
    w1, b1, w2, b2 = init_params(kp, input_size, hidden_size, output_size)

    forward = make_mlp(w1, b1, w2, b2)   # weights padded once, outside hot path
    out = forward(x)                     # demo: tb=64, grid=(1,), no padding copies
    jax.block_until_ready(out)

    # Pure-JAX reference check.
    ref = jax.nn.softmax(jax.nn.sigmoid(x @ w1 + b1) @ w2 + b2, axis=1)
    assert out.shape == (batch, output_size)
    assert jnp.allclose(out, ref, atol=2e-5, rtol=1e-4), float(jnp.max(jnp.abs(out - ref)))
    assert jnp.allclose(jnp.sum(out, axis=1), 1.0, atol=2e-5)

    print("KERNEL_OK")
</pallas_src>

<mosaic_0001>
module attributes {stable_mosaic.version = 11 : i64} {
  func.func @mlp_kernel(%arg0: i32, %arg1: memref<64x4xf32, #tpu.memory_space<vmem>>, %arg2: memref<4x128xf32, #tpu.memory_space<vmem>>, %arg3: memref<1x128xf32, #tpu.memory_space<vmem>>, %arg4: memref<128x128xf32, #tpu.memory_space<vmem>>, %arg5: memref<1x128xf32, #tpu.memory_space<vmem>>, %arg6: memref<64x3xf32, #tpu.memory_space<vmem>>) attributes {dimension_semantics = [#tpu.dimension_semantics<parallel>], iteration_bounds = array<i64: 1>, scalar_prefetch = 0 : i64, scratch_operands = 0 : i64, tpu.core_type = #tpu.core_type<tc>, window_params = [{transform_indices = @transform_0, window_bounds = array<i64: 64, 4>}, {pipeline_mode = #tpu.pipeline_mode<synchronous>, transform_indices = @transform_1, window_bounds = array<i64: 4, 128>}, {pipeline_mode = #tpu.pipeline_mode<synchronous>, transform_indices = @transform_2, window_bounds = array<i64: 1, 128>}, {pipeline_mode = #tpu.pipeline_mode<synchronous>, transform_indices = @transform_3, window_bounds = array<i64: 128, 128>}, {pipeline_mode = #tpu.pipeline_mode<synchronous>, transform_indices = @transform_4, window_bounds = array<i64: 1, 128>}, {transform_indices = @transform_5, window_bounds = array<i64: 64, 3>}]} {
    %c0 = arith.constant 0 : index
    %c0_0 = arith.constant 0 : index
    %0 = vector.load %arg1[%c0, %c0_0] : memref<64x4xf32, #tpu.memory_space<vmem>>, vector<64x4xf32>
    %c0_1 = arith.constant 0 : index
    %c0_2 = arith.constant 0 : index
    %1 = vector.load %arg2[%c0_1, %c0_2] : memref<4x128xf32, #tpu.memory_space<vmem>>, vector<4x128xf32>
    %cst = arith.constant dense<0.000000e+00> : vector<64x128xf32>
    %2 = tpu.matmul %0, %1, %cst {dimension_numbers = #tpu.dot_dimension_numbers<[1], [0], [0], [1], [0, 0, 1, 1], [], []>} : vector<64x4xf32>, vector<4x128xf32>, vector<64x128xf32> -> vector<64x128xf32>
    %c0_3 = arith.constant 0 : index
    %c0_4 = arith.constant 0 : index
    %3 = vector.load %arg3[%c0_3, %c0_4] : memref<1x128xf32, #tpu.memory_space<vmem>>, vector<1x128xf32>
    %4 = vector.broadcast %3 : vector<1x128xf32> to vector<64x128xf32>
    %5 = arith.addf %2, %4 : vector<64x128xf32>
    %6 = arith.negf %5 : vector<64x128xf32>
    %7 = math.exp %6 : vector<64x128xf32>
    %cst_5 = arith.constant 1.000000e+00 : f32
    %8 = vector.broadcast %cst_5 : f32 to vector<64x128xf32>
    %9 = arith.addf %8, %7 : vector<64x128xf32>
    %10 = arith.divf %8, %9 : vector<64x128xf32>
    %c0_6 = arith.constant 0 : index
    %c0_7 = arith.constant 0 : index
    %11 = vector.load %arg4[%c0_6, %c0_7] : memref<128x128xf32, #tpu.memory_space<vmem>>, vector<128x128xf32>
    %cst_8 = arith.constant dense<0.000000e+00> : vector<64x128xf32>
    %12 = tpu.matmul %10, %11, %cst_8 {dimension_numbers = #tpu.dot_dimension_numbers<[1], [0], [0], [1], [0, 0, 1, 1], [], []>} : vector<64x128xf32>, vector<128x128xf32>, vector<64x128xf32> -> vector<64x128xf32>
    %c0_9 = arith.constant 0 : index
    %c0_10 = arith.constant 0 : index
    %13 = vector.load %arg5[%c0_9, %c0_10] : memref<1x128xf32, #tpu.memory_space<vmem>>, vector<1x128xf32>
    %14 = vector.broadcast %13 : vector<1x128xf32> to vector<64x128xf32>
    %15 = arith.addf %12, %14 : vector<64x128xf32>
    %cst_11 = arith.constant dense<0xFF800000> : vector<64xf32>
    %16 = vector.multi_reduction <maximumf>, %15, %cst_11 [1] : vector<64x128xf32> to vector<64xf32>
    %17 = vector.shape_cast %16 : vector<64xf32> to vector<64x1xf32>
    %18 = vector.broadcast %17 : vector<64x1xf32> to vector<64x128xf32>
    %19 = arith.subf %15, %18 : vector<64x128xf32>
    %20 = math.exp %19 : vector<64x128xf32>
    %cst_12 = arith.constant dense<0.000000e+00> : vector<64xf32>
    %21 = vector.multi_reduction <add>, %20, %cst_12 [1] : vector<64x128xf32> to vector<64xf32>
    %22 = vector.shape_cast %21 : vector<64xf32> to vector<64x1xf32>
    %23 = tpu.reciprocal %22 {approx = true} : vector<64x1xf32> -> vector<64x1xf32>
    %24 = arith.mulf %22, %23 : vector<64x1xf32>
    %cst_13 = arith.constant 2.000000e+00 : f32
    %25 = vector.broadcast %cst_13 : f32 to vector<64x1xf32>
    %26 = arith.subf %25, %24 : vector<64x1xf32>
    %27 = arith.mulf %23, %26 : vector<64x1xf32>
    %28 = vector.broadcast %27 : vector<64x1xf32> to vector<64x128xf32>
    %29 = arith.mulf %20, %28 : vector<64x128xf32>
    %30 = vector.extract_strided_slice %29 {offsets = [0, 0], sizes = [64, 3], strides = [1, 1]} : vector<64x128xf32> to vector<64x3xf32>
    %c0_14 = arith.constant 0 : index
    %c0_15 = arith.constant 0 : index
    %31 = vector.load %arg6[%c0_14, %c0_15] : memref<64x3xf32, #tpu.memory_space<vmem>>, vector<64x3xf32>
    tpu.vector_store %arg6[%c0_14, %c0_15], %30 {strides = array<i32>} : memref<64x3xf32, #tpu.memory_space<vmem>>, vector<64x3xf32>,
    return
  }
  func.func @transform_0(%arg0: i32) -> (i32, i32) {
    %c0_i32 = arith.constant 0 : i32
    %c0_i32_0 = arith.constant 0 : i32
    return %arg0, %c0_i32 : i32, i32
  }
  func.func @transform_1(%arg0: i32) -> (i32, i32) {
    %c0_i32 = arith.constant 0 : i32
    %c0_i32_0 = arith.constant 0 : i32
    %c0_i32_1 = arith.constant 0 : i32
    return %c0_i32, %c0_i32_0 : i32, i32
  }
  func.func @transform_2(%arg0: i32) -> (i32, i32) {
    %c0_i32 = arith.constant 0 : i32
    %c0_i32_0 = arith.constant 0 : i32
    %c0_i32_1 = arith.constant 0 : i32
    return %c0_i32, %c0_i32_0 : i32, i32
  }
  func.func @transform_3(%arg0: i32) -> (i32, i32) {
    %c0_i32 = arith.constant 0 : i32
    %c0_i32_0 = arith.constant 0 : i32
    %c0_i32_1 = arith.constant 0 : i32
    return %c0_i32, %c0_i32_0 : i32, i32
  }
  func.func @transform_4(%arg0: i32) -> (i32, i32) {
    %c0_i32 = arith.constant 0 : i32
    %c0_i32_0 = arith.constant 0 : i32
    %c0_i32_1 = arith.constant 0 : i32
    return %c0_i32, %c0_i32_0 : i32, i32
  }
  func.func @transform_5(%arg0: i32) -> (i32, i32) {
    %c0_i32 = arith.constant 0 : i32
    %c0_i32_0 = arith.constant 0 : i32
    return %arg0, %c0_i32 : i32, i32
  }
}

</mosaic_0001>

<bundles_post_ra>
// kernel: forward.1
= control target key start
LH: loop header
LB: loop body
LE: loop exit
PB: predicated region body
PF: predicated region fallthrough
CT: control target
= control target key end

     0   :  { %10 = vsyncpa [#allocation3], 0  ;;  %s586_s21 = smov [#allocation2]   ;;  %s587_s23 = smov 128   ;;  %s713_s0 = inlined_call_operand.vmem [shape: f32[64,4], index: 0, kind: input, shape index: {}]   ;;  %s714_s1 = inlined_call_operand.vmem [shape: f32[4,128], index: 1, kind: input, shape index: {}]   ;;  %s715_s2 = inlined_call_operand.vmem [shape: f32[1,128], index: 2, kind: input, shape index: {}]   ;;  %s716_s3 = inlined_call_operand.hbm [shape: f32[128,128], index: 3, kind: input, shape index: {}]   ;;  %s717_s4 = inlined_call_operand.vmem [shape: f32[1,128], index: 4, kind: input, shape index: {}]   ;;  %s718_s5 = inlined_call_operand.vmem [shape: f32[64,3], index: 5, kind: output, shape index: {}]  }
   0x1   :  { %s21_s20 = sshll.u32 %s716_s3, 4  ;;  %s23_s22 = sshll.u32 %s586_s21, 4  ;;  %s22_s20 = int_to_ptr.hbm [resolvable:$true] %s21_s20  ;;  %s24_s22 = int_to_ptr.vmem [resolvable:$true] %s23_s22 }
   0x2   :  { %s588_s24 = smov 8  }
   0x3   :  { %29 = dma.hbm_to_vmem [thread:$0]  %s22_s20, 2048, %s24_s22, [#allocation3], %s587_s23, %s587_s23, %s588_s24  }
   0x4   :  { %584 = dma.done.wait [#allocation3], 2048  }
   0x5   :  { %585 = vsyncadd [#allocation3], 4294965248  ;;  %vm74_vm0 = vcmask 1043456   ;;  %vm49_vm1 = vcmask 31744   ;;  %v44_v0 = vld [vmem:[%s714_s1] sm:$0xf] }
   0x6   :  { %v36_v1 = vld [vmem:[%s713_s0] sm:$0xff]  ;;  %442 = vmatpush.msk.msra.mxu0 %vm74_vm0, %v44_v0  ;;  %v37_v2 = vld [vmem:[%s713_s0 + $0x8] sm:$0xff]  ;;  %v38_v3 = vld [vmem:[%s713_s0 + $0x10] sm:$0xff] }
   0x7   :  { %443 = vmatmul.msk.f32.vlgmr.msra.gmra.mxu0 %vm49_vm1, %v36_v1  ;;  %v39_v4 = vld [vmem:[%s713_s0 + $0x18] sm:$0xff]  ;;  %v40_v5 = vld [vmem:[%s713_s0 + $0x20] sm:$0xff]  ;;  %v41_v6 = vld [vmem:[%s713_s0 + $0x28] sm:$0xff] }
   0x8   :  { %v42_v7 = vld [vmem:[%s713_s0 + $0x30] sm:$0xff]  ;;  %v43_v8 = vld [vmem:[%s713_s0 + $0x38] sm:$0xff]  ;;  %v284_v11 = vld [vmem:[#allocation2 + $0x68] sm:$0xff] }
   0x9   :  { %v286_v9 = vld [vmem:[#allocation2 + $0x78] sm:$0xff]  ;;  %v285_v10 = vld [vmem:[#allocation2 + $0x70] sm:$0xff]  ;;  %v283_v12 = vld [vmem:[#allocation2 + $0x60] sm:$0xff] }
   0xa   :  { %291 = vmatpush.msra.mxu1 %v286_v9  ;;  %459 = vmatpush.msra.mxu2 %v286_v9  ;;  %v282_v13 = vld [vmem:[#allocation2 + $0x58] sm:$0xff]  ;;  %v281_v14 = vld [vmem:[#allocation2 + $0x50] sm:$0xff]  ;;  %v280_v15 = vld [vmem:[#allocation2 + $0x48] sm:$0xff] }
   0xb   :  { %460 = vmatpush.msra.mxu3 %v286_v9  ;;  %v279_v16 = vld [vmem:[#allocation2 + $0x40] sm:$0xff]  ;;  %v278_v17 = vld [vmem:[#allocation2 + $0x38] sm:$0xff]  ;;  %v277_v18 = vld [vmem:[#allocation2 + $0x30] sm:$0xff] }
   0xc   :  { %292 = vmatpush.msra.mxu1 %v285_v10  ;;  %461 = vmatpush.msra.mxu2 %v285_v10  ;;  %v276_v19 = vld [vmem:[#allocation2 + $0x28] sm:$0xff]  ;;  %v275_v20 = vld [vmem:[#allocation2 + $0x20] sm:$0xff]  ;;  %v274_v21 = vld [vmem:[#allocation2 + $0x18] sm:$0xff] }
   0xd   :  { %462 = vmatpush.msra.mxu3 %v285_v10  ;;  %v273_v22 = vld [vmem:[#allocation2 + $0x10] sm:$0xff]  ;;  %v272_v23 = vld [vmem:[#allocation2 + $0x8] sm:$0xff]  ;;  %v660_v24 = vld [vmem:[%s715_s2] ss:$0 sm:$0xff] }
   0xe   :  { %293 = vmatpush.msra.mxu1 %v284_v11  ;;  %463 = vmatpush.msra.mxu2 %v284_v11  ;;  %v271_v25 = vld [vmem:[#allocation2] sm:$0xff] }
   0xf   :  { %444 = vmatmul.msk.f32.gmra.mxu0 %vm49_vm1, %v37_v2  ;;  %464 = vmatpush.msra.mxu3 %v284_v11 }
  0x10   :  { %294 = vmatpush.msra.mxu1 %v283_v12  ;;  %465 = vmatpush.msra.mxu2 %v283_v12 }
  0x11   :  { %466 = vmatpush.msra.mxu3 %v283_v12 }
  0x12   :  { %295 = vmatpush.msra.mxu1 %v282_v13  ;;  %467 = vmatpush.msra.mxu2 %v282_v13 }
  0x13   :  { %468 = vmatpush.msra.mxu3 %v282_v13 }
  0x14   :  { %296 = vmatpush.msra.mxu1 %v281_v14  ;;  %469 = vmatpush.msra.mxu2 %v281_v14 }
  0x15   :  { %470 = vmatpush.msra.mxu3 %v281_v14 }
  0x16   :  { %297 = vmatpush.msra.mxu1 %v280_v15  ;;  %471 = vmatpush.msra.mxu2 %v280_v15 }
  0x17   :  { %445 = vmatmul.msk.f32.gmra.mxu0 %vm49_vm1, %v38_v3  ;;  %472 = vmatpush.msra.mxu3 %v280_v15 }
  0x18   :  { %298 = vmatpush.msra.mxu1 %v279_v16  ;;  %473 = vmatpush.msra.mxu2 %v279_v16 }
  0x19   :  { %474 = vmatpush.msra.mxu3 %v279_v16 }
  0x1a   :  { %299 = vmatpush.msra.mxu1 %v278_v17  ;;  %475 = vmatpush.msra.mxu2 %v278_v17 }
  0x1b   :  { %476 = vmatpush.msra.mxu3 %v278_v17 }
  0x1c   :  { %300 = vmatpush.msra.mxu1 %v277_v18  ;;  %477 = vmatpush.msra.mxu2 %v277_v18 }
  0x1d   :  { %478 = vmatpush.msra.mxu3 %v277_v18 }
  0x1e   :  { %301 = vmatpush.msra.mxu1 %v276_v19  ;;  %479 = vmatpush.msra.mxu2 %v276_v19 }
  0x1f   :  { %446 = vmatmul.msk.f32.gmra.mxu0 %vm49_vm1, %v39_v4  ;;  %480 = vmatpush.msra.mxu3 %v276_v19 }
  0x20   :  { %302 = vmatpush.msra.mxu1 %v275_v20  ;;  %481 = vmatpush.msra.mxu2 %v275_v20 }
  0x21   :  { %482 = vmatpush.msra.mxu3 %v275_v20 }
  0x22   :  { %303 = vmatpush.msra.mxu1 %v274_v21  ;;  %483 = vmatpush.msra.mxu2 %v274_v21 }
  0x23   :  { %484 = vmatpush.msra.mxu3 %v274_v21 }
  0x24   :  { %304 = vmatpush.msra.mxu1 %v273_v22  ;;  %485 = vmatpush.msra.mxu2 %v273_v22 }
  0x25   :  { %486 = vmatpush.msra.mxu3 %v273_v22 }
  0x26   :  { %305 = vmatpush.msra.mxu1 %v272_v23  ;;  %487 = vmatpush.msra.mxu2 %v272_v23 }
  0x27   :  { %447 = vmatmul.msk.f32.gmra.mxu0 %vm49_vm1, %v40_v5  ;;  %488 = vmatpush.msra.mxu3 %v272_v23 }
  0x28   :  { %306 = vmatpush.msra.mxu1 %v271_v25  ;;  %489 = vmatpush.msra.mxu2 %v271_v25 }
  0x29   :  { %490 = vmatpush.msra.mxu3 %v271_v25 }
  0x2f   :  { %448 = vmatmul.msk.f32.gmra.mxu0 %vm49_vm1, %v41_v6 }
  0x37   :  { %449 = vmatmul.msk.f32.gmra.mxu0 %vm49_vm1, %v42_v7 }
  0x3f   :  { %450 = vmatmul.msk.f32.gmra.mxu0 %vm49_vm1, %v43_v8 }
  0x84   :  { %v95_v26 = vpop.f32.mrf.mxu0 }
  0x85   :  { %v96_v27 = vadd.f32 %v660_v24, %v95_v26 }
  0x87   :  { %v451_v28 = vmul.f32 -1.442695, %v96_v27 }
  0x89   :  { %496 = vpow2.f32 %v451_v28 }
  0x8c   :  { %v98_v29 = vpop.f32.mrf.mxu0 }
  0x8d   :  { %v99_v30 = vadd.f32 %v660_v24, %v98_v29 }
  0x8f   :  { %v497_v31 = vpop.eup %496  ;;  %v452_v32 = vmul.f32 -1.442695, %v99_v30 }
  0x90   :  { %v143_v33 = vadd.f32 1.0, %v497_v31 }
  0x91   :  { %498 = vpow2.f32 %v452_v32 }
  0x92   :  { %500 = vrcp.f32 %v143_v33  ;;  %v162_v43 = vand.u32 2147483648, %v143_v33  ;;  %v160_v46 = vand.u32 2147483647, %v143_v33  ;;  %vm156_vm3 = vweird.f32 %v143_v33 }
  0x94   :  { %v101_v34 = vpop.f32.mrf.mxu0  ;;  %v163_v52 = vor.u32 1.1754944e-38, %v162_v43  ;;  %vm161_vm5 = vcmp.eq.f32.partialorder %v160_v46, 8.507059e+37 }
  0x95   :  { %v102_v35 = vadd.f32 %v660_v24, %v101_v34 }
  0x97   :  { %v499_v36 = vpop.eup %498  ;;  %v453_v37 = vmul.f32 -1.442695, %v102_v35 }
  0x98   :  { %v501_v38 = vpop.eup %500  ;;  %v144_v39 = vadd.f32 1.0, %v499_v36 }
  0x99   :  { %502 = vpow2.f32 %v453_v37  ;;  %v152_v40 = vmul.f32 %v501_v38, %v143_v33  ;;  %vm157_vm2 = vweird.f32 %v501_v38 }
  0x9a   :  { %504 = vrcp.f32 %v144_v39  ;;  %vm158_vm4 = vmor %vm156_vm3, %vm157_vm2  ;;  %v177_v58 = vand.u32 2147483648, %v144_v39  ;;  %v175_v61 = vand.u32 2147483647, %v144_v39  ;;  %vm171_vm7 = vweird.f32 %v144_v39 }
  0x9b   :  { %v153_v41 = vsub.f32 1.0, %v152_v40 }
  0x9c   :  { %v104_v42 = vpop.f32.mrf.mxu0  ;;  %v178_v3 = vor.u32 1.1754944e-38, %v177_v58  ;;  %vm176_vm9 = vcmp.eq.f32.partialorder %v175_v61, 8.507059e+37 }
  0x9d   :  { %v105_v44 = vadd.f32 %v660_v24, %v104_v42  ;;  %v154_v45 = vmul.f32 %v501_v38, %v153_v41 }
  0x9f   :  { %v503_v47 = vpop.eup %502  ;;  %v454_v48 = vmul.f32 -1.442695, %v105_v44  ;;  %v155_v49 = vadd.f32 %v501_v38, %v154_v45 }
  0xa0   :  { %v505_v50 = vpop.eup %504  ;;  %v145_v51 = vadd.f32 1.0, %v503_v47 }
  0xa1   :  { %506 = vpow2.f32 %v454_v48  ;;  %v159_v53 = vsel %vm158_vm4, %v501_v38, %v155_v49  ;;  %v167_v54 = vmul.f32 %v505_v50, %v144_v39  ;;  %vm172_vm6 = vweird.f32 %v505_v50 }
  0xa2   :  { %508 = vrcp.f32 %v145_v51  ;;  %v164_v55 = vsel %vm161_vm5, %v163_v52, %v159_v53  ;;  %vm173_vm8 = vmor %vm171_vm7, %vm172_vm6  ;;  %v192_v9 = vand.u32 2147483648, %v145_v51  ;;  %v190_v12 = vand.u32 2147483647, %v145_v51 }
  0xa3   :  { %307 = vmatmul.f32.vlgmr.msra.gmra.mxu1 %v164_v55  ;;  %v168_v56 = vsub.f32 1.0, %v167_v54  ;;  %vm186_vm11 = vweird.f32 %v145_v51 }
  0xa4   :  { %v107_v57 = vpop.f32.mrf.mxu0  ;;  %v193_v18 = vor.u32 1.1754944e-38, %v192_v9  ;;  %vm191_vm13 = vcmp.eq.f32.partialorder %v190_v12, 8.507059e+37 }
  0xa5   :  { %v108_v59 = vadd.f32 %v660_v24, %v107_v57  ;;  %v169_v60 = vmul.f32 %v505_v50, %v168_v56 }
  0xa7   :  { %v507_v62 = vpop.eup %506  ;;  %v455_v63 = vmul.f32 -1.442695, %v108_v59  ;;  %v170_v0 = vadd.f32 %v505_v50, %v169_v60 }
  0xa8   :  { %v509_v1 = vpop.eup %508  ;;  %v146_v2 = vadd.f32 1.0, %v507_v62 }
  0xa9   :  { %510 = vpow2.f32 %v455_v63  ;;  %v174_v4 = vsel %vm173_vm8, %v505_v50, %v170_v0  ;;  %v182_v5 = vmul.f32 %v509_v1, %v145_v51  ;;  %vm187_vm10 = vweird.f32 %v509_v1 }
  0xaa   :  { %512 = vrcp.f32 %v146_v2  ;;  %v179_v6 = vsel %vm176_vm9, %v178_v3, %v174_v4  ;;  %vm188_vm12 = vmor %vm186_vm11, %vm187_vm10  ;;  %v207_v25 = vand.u32 2147483648, %v146_v2  ;;  %v205_v28 = vand.u32 2147483647, %v146_v2 }
  0xab   :  { %310 = vmatmul.f32.gmra.mxu1 %v179_v6  ;;  %v183_v7 = vsub.f32 1.0, %v182_v5  ;;  %vm201_vm15 = vweird.f32 %v146_v2 }
  0xac   :  { %v110_v8 = vpop.f32.mrf.mxu0  ;;  %v208_v34 = vor.u32 1.1754944e-38, %v207_v25  ;;  %vm206_vm1 = vcmp.eq.f32.partialorder %v205_v28, 8.507059e+37 }
  0xad   :  { %v111_v10 = vadd.f32 %v660_v24, %v110_v8  ;;  %v184_v11 = vmul.f32 %v509_v1, %v183_v7 }
  0xaf   :  { %v511_v13 = vpop.eup %510  ;;  %v456_v14 = vmul.f32 -1.442695, %v111_v10  ;;  %v185_v15 = vadd.f32 %v509_v1, %v184_v11 }
  0xb0   :  { %v513_v16 = vpop.eup %512  ;;  %v147_v17 = vadd.f32 1.0, %v511_v13 }
  0xb1   :  { %514 = vpow2.f32 %v456_v14  ;;  %v189_v19 = vsel %vm188_vm12, %v509_v1, %v185_v15  ;;  %v197_v20 = vmul.f32 %v513_v16, %v146_v2  ;;  %vm202_vm14 = vweird.f32 %v513_v16 }
  0xb2   :  { %516 = vrcp.f32 %v147_v17  ;;  %v194_v21 = vsel %vm191_vm13, %v193_v18, %v189_v19  ;;  %vm203_vm0 = vmor %vm201_vm15, %vm202_vm14  ;;  %v222_v40 = vand.u32 2147483648, %v147_v17  ;;  %v220_v43 = vand.u32 2147483647, %v147_v17  ;;  %v495_v18 = vld [vmem:[%s717_s4] ss:$0 sm:$0xff] }
  0xb3   :  { %313 = vmatmul.f32.vlgmr.msra.gmra.mxu2 %v194_v21  ;;  %v198_v22 = vsub.f32 1.0, %v197_v20  ;;  %vm216_vm3 = vweird.f32 %v147_v17 }
  0xb4   :  { %v113_v23 = vpop.f32.mrf.mxu0  ;;  %v223_v49 = vor.u32 1.1754944e-38, %v222_v40  ;;  %vm221_vm5 = vcmp.eq.f32.partialorder %v220_v43, 8.507059e+37 }
  0xb5   :  { %v114_v26 = vadd.f32 %v660_v24, %v113_v23  ;;  %v199_v27 = vmul.f32 %v513_v16, %v198_v22 }
  0xb7   :  { %v515_v29 = vpop.eup %514  ;;  %v457_v30 = vmul.f32 -1.442695, %v114_v26  ;;  %v200_v31 = vadd.f32 %v513_v16, %v199_v27 }
  0xb8   :  { %v517_v32 = vpop.eup %516  ;;  %v148_v33 = vadd.f32 1.0, %v515_v29 }
  0xb9   :  { %518 = vpow2.f32 %v457_v30  ;;  %v204_v35 = vsel %vm203_vm0, %v513_v16, %v200_v31  ;;  %v212_v36 = vmul.f32 %v517_v32, %v147_v17  ;;  %vm217_vm2 = vweird.f32 %v517_v32 }
  0xba   :  { %520 = vrcp.f32 %v148_v33  ;;  %v209_v37 = vsel %vm206_vm1, %v208_v34, %v204_v35  ;;  %vm218_vm4 = vmor %vm216_vm3, %vm217_vm2  ;;  %v235_v55 = vand.u32 2147483647, %v148_v33  ;;  %vm231_vm7 = vweird.f32 %v148_v33 }
  0xbb   :  { %316 = vmatmul.f32.gmra.mxu2 %v209_v37  ;;  %v213_v38 = vsub.f32 1.0, %v212_v36  ;;  %vm428_vm2 = vcmask 23552  }
  0xbc   :  { %v116_v39 = vpop.f32.mrf.mxu0  ;;  %vm236_vm9 = vcmp.eq.f32.partialorder %v235_v55, 8.507059e+37 }
  0xbd   :  { %v117_v41 = vadd.f32 %v660_v24, %v116_v39  ;;  %v214_v42 = vmul.f32 %v517_v32, %v213_v38  ;;  %v237_v24 = vand.u32 2147483648, %v148_v33 }
  0xbf   :  { %v519_v44 = vpop.eup %518  ;;  %v458_v45 = vmul.f32 -1.442695, %v117_v41  ;;  %v215_v46 = vadd.f32 %v517_v32, %v214_v42  ;;  %v238_v60 = vor.u32 1.1754944e-38, %v237_v24 }
  0xc0   :  { %v521_v47 = vpop.eup %520  ;;  %v149_v48 = vadd.f32 1.0, %v519_v44 }
  0xc1   :  { %522 = vpow2.f32 %v458_v45  ;;  %v219_v50 = vsel %vm218_vm4, %v517_v32, %v215_v46  ;;  %v227_v51 = vmul.f32 %v521_v47, %v148_v33  ;;  %vm232_vm6 = vweird.f32 %v521_v47 }
  0xc2   :  { %524 = vrcp.f32 %v149_v48  ;;  %v224_v52 = vsel %vm221_vm5, %v223_v49, %v219_v50  ;;  %vm233_vm8 = vmor %vm231_vm7, %vm232_vm6  ;;  %v252_v1 = vand.u32 2147483648, %v149_v48  ;;  %v250_v3 = vand.u32 2147483647, %v149_v48 }
  0xc3   :  { %319 = vmatmul.f32.gmra.mxu2 %v224_v52  ;;  %v228_v53 = vsub.f32 1.0, %v227_v51  ;;  %vm246_vm11 = vweird.f32 %v149_v48 }
  0xc4   :  { %v253_v6 = vor.u32 1.1754944e-38, %v252_v1  ;;  %vm251_vm13 = vcmp.eq.f32.partialorder %v250_v3, 8.507059e+37 }
  0xc5   :  { %v229_v54 = vmul.f32 %v521_v47, %v228_v53 }
  0xc7   :  { %v523_v56 = vpop.eup %522  ;;  %v230_v57 = vadd.f32 %v521_v47, %v229_v54 }
  0xc8   :  { %v525_v58 = vpop.eup %524  ;;  %v150_v59 = vadd.f32 1.0, %v523_v56 }
  0xc9   :  { %v234_v61 = vsel %vm233_vm8, %v521_v47, %v230_v57  ;;  %v242_v62 = vmul.f32 %v525_v58, %v149_v48  ;;  %vm247_vm10 = vweird.f32 %v525_v58 }
  0xca   :  { %526 = vrcp.f32 %v150_v59  ;;  %v239_v63 = vsel %vm236_vm9, %v238_v60, %v234_v61  ;;  %vm248_vm12 = vmor %vm246_vm11, %vm247_vm10  ;;  %v267_v11 = vand.u32 2147483648, %v150_v59  ;;  %v265_v13 = vand.u32 2147483647, %v150_v59 }
  0xcb   :  { %322 = vmatmul.f32.vlgmr.msra.gmra.mxu3 %v239_v63  ;;  %v243_v0 = vsub.f32 1.0, %v242_v62  ;;  %vm261_vm15 = vweird.f32 %v150_v59 }
  0xcc   :  { %v268_v15 = vor.u32 1.1754944e-38, %v267_v11  ;;  %vm266_vm1 = vcmp.eq.f32.partialorder %v265_v13, 8.507059e+37 }
  0xcd   :  { %v244_v2 = vmul.f32 %v525_v58, %v243_v0 }
  0xcf   :  { %v245_v4 = vadd.f32 %v525_v58, %v244_v2 }
  0xd0   :  { %v527_v5 = vpop.eup %526 }
  0xd1   :  { %v249_v7 = vsel %vm248_vm12, %v525_v58, %v245_v4  ;;  %v257_v8 = vmul.f32 %v527_v5, %v150_v59  ;;  %vm262_vm14 = vweird.f32 %v527_v5 }
  0xd2   :  { %v254_v9 = vsel %vm251_vm13, %v253_v6, %v249_v7  ;;  %vm263_vm0 = vmor %vm261_vm15, %vm262_vm14 }
  0xd3   :  { %325 = vmatmul.f32.gmra.mxu3 %v254_v9  ;;  %v258_v10 = vsub.f32 1.0, %v257_v8 }
  0xd5   :  { %v259_v12 = vmul.f32 %v527_v5, %v258_v10 }
  0xd7   :  { %v260_v14 = vadd.f32 %v527_v5, %v259_v12 }
  0xd9   :  { %v264_v16 = vsel %vm263_vm0, %v527_v5, %v260_v14 }
  0xda   :  { %v269_v17 = vsel %vm266_vm1, %v268_v15, %v264_v16 }
  0xdb   :  { %328 = vmatmul.f32.gmra.mxu3 %v269_v17 }
 0x120   :  { %v308_v19 = vpop.f32.mrf.mxu1 }
 0x121   :  { %v309_v20 = vadd.f32 %v495_v18, %v308_v19 }
 0x123   :  { %332 = vmax.xlane.f32.xlu0 %v309_v20 }
 0x128   :  { %v311_v21 = vpop.f32.mrf.mxu1 }
 0x129   :  { %v312_v22 = vadd.f32 %v495_v18, %v311_v21 }
 0x12b   :  { %334 = vmax.xlane.f32.xlu0 %v312_v22 }
 0x136   :  { %v314_v23 = vpop.f32.mrf.mxu2 }
 0x137   :  { %v315_v25 = vadd.f32 %v495_v18, %v314_v23 }
 0x139   :  { %336 = vmax.xlane.f32.xlu1 %v315_v25 }
 0x13e   :  { %v317_v26 = vpop.f32.mrf.mxu2 }
 0x13f   :  { %v318_v27 = vadd.f32 %v495_v18, %v317_v26 }
 0x141   :  { %338 = vmax.xlane.f32.xlu1 %v318_v27 }
 0x146   :  { %v320_v28 = vpop.f32.mrf.mxu2 }
 0x147   :  { %v321_v29 = vadd.f32 %v495_v18, %v320_v28 }
 0x149   :  { %340 = vmax.xlane.f32.xlu2 %v321_v29 }
 0x14e   :  { %v323_v30 = vpop.f32.mrf.mxu3 }
 0x14f   :  { %v324_v31 = vadd.f32 %v495_v18, %v323_v30 }
 0x151   :  { %342 = vmax.xlane.f32.xlu2 %v324_v31 }
 0x156   :  { %v326_v32 = vpop.f32.mrf.mxu3 }
 0x157   :  { %v327_v33 = vadd.f32 %v495_v18, %v326_v32 }
 0x159   :  { %344 = vmax.xlane.f32.xlu0 %v327_v33 }
 0x15e   :  { %v329_v34 = vpop.f32.mrf.mxu3 }
 0x15f   :  { %v330_v35 = vadd.f32 %v495_v18, %v329_v34 }
 0x161   :  { %346 = vmax.xlane.f32.xlu1 %v330_v35 }
 0x196   :  { %v333_v36 = vpop.xlane.xlu0 %332 }
 0x197   :  { %v348_v37 = vsub.f32 %v309_v20, %v333_v36 }
 0x199   :  { %v356_v38 = vmul.f32 1.442695, %v348_v37 }
 0x19b   :  { %528 = vpow2.f32 %v356_v38 }
 0x19e   :  { %v335_v39 = vpop.xlane.xlu0 %334 }
 0x19f   :  { %v349_v40 = vsub.f32 %v312_v22, %v335_v39 }
 0x1a1   :  { %v529_v41 = vpop.eup %528  ;;  %v358_v42 = vmul.f32 1.442695, %v349_v40 }
 0x1a2   :  { %372 = vadd.xlane.f32.xlu2 %v529_v41 }
 0x1a3   :  { %530 = vpow2.f32 %v358_v42 }
 0x1a9   :  { %v531_v43 = vpop.eup %530 }
 0x1aa   :  { %374 = vadd.xlane.f32.xlu0 %v531_v43 }
 0x1ac   :  { %v337_v44 = vpop.xlane.xlu1 %336 }
 0x1ad   :  { %v350_v45 = vsub.f32 %v315_v25, %v337_v44 }
 0x1af   :  { %v360_v46 = vmul.f32 1.442695, %v350_v45 }
 0x1b1   :  { %532 = vpow2.f32 %v360_v46 }
 0x1b4   :  { %v339_v47 = vpop.xlane.xlu1 %338 }
 0x1b5   :  { %v351_v48 = vsub.f32 %v318_v27, %v339_v47 }
 0x1b7   :  { %v533_v49 = vpop.eup %532  ;;  %v362_v50 = vmul.f32 1.442695, %v351_v48 }
 0x1b8   :  { %376 = vadd.xlane.f32.xlu1 %v533_v49 }
 0x1b9   :  { %534 = vpow2.f32 %v362_v50 }
 0x1bc   :  { %v341_v51 = vpop.xlane.xlu2 %340 }
 0x1bd   :  { %v352_v52 = vsub.f32 %v321_v29, %v341_v51 }
 0x1bf   :  { %v535_v53 = vpop.eup %534  ;;  %v364_v24 = vmul.f32 1.442695, %v352_v52 }
 0x1c0   :  { %378 = vadd.xlane.f32.xlu2 %v535_v53 }
 0x1c1   :  { %536 = vpow2.f32 %v364_v24 }
 0x1c4   :  { %v343_v54 = vpop.xlane.xlu2 %342 }
 0x1c5   :  { %v353_v55 = vsub.f32 %v324_v31, %v343_v54 }
 0x1c7   :  { %v537_v56 = vpop.eup %536  ;;  %v366_v57 = vmul.f32 1.442695, %v353_v55 }
 0x1c8   :  { %380 = vadd.xlane.f32.xlu0 %v537_v56 }
 0x1c9   :  { %538 = vpow2.f32 %v366_v57 }
 0x1cc   :  { %v345_v58 = vpop.xlane.xlu0 %344 }
 0x1cd   :  { %v354_v59 = vsub.f32 %v327_v33, %v345_v58 }
 0x1cf   :  { %v539_v60 = vpop.eup %538  ;;  %v368_v61 = vmul.f32 1.442695, %v354_v59 }
 0x1d0   :  { %382 = vadd.xlane.f32.xlu1 %v539_v60 }
 0x1d1   :  { %540 = vpow2.f32 %v368_v61 }
 0x1d4   :  { %v347_v62 = vpop.xlane.xlu1 %346 }
 0x1d5   :  { %v355_v63 = vsub.f32 %v330_v35, %v347_v62 }
 0x1d7   :  { %v673_v0 = vpop.eup %540  ;;  %v370_v1 = vmul.f32 1.442695, %v355_v63 }
 0x1d8   :  { %384 = vadd.xlane.f32.xlu2 %v673_v0 }
 0x1d9   :  { %542 = vpow2.f32 %v370_v1 }
 0x1df   :  { %v676_v2 = vpop.eup %542 }
 0x1e0   :  { %386 = vadd.xlane.f32.xlu0 %v676_v2 }
 0x215   :  { %v373_v3 = vpop.xlane.xlu2 %372 }
 0x216   :  { %544 = vrcp.f32 %v373_v3 }
 0x21c   :  { %v545_v4 = vpop.eup %544 }
 0x21d   :  { %v396_v5 = vmul.f32 %v545_v4, %v373_v3  ;;  %v375_v6 = vpop.xlane.xlu0 %374 }
 0x21e   :  { %546 = vrcp.f32 %v375_v6 }
 0x21f   :  { %v404_v7 = vsub.f32 2.0, %v396_v5 }
 0x221   :  { %v412_v8 = vmul.f32 %v545_v4, %v404_v7 }
 0x223   :  { %v420_v9 = vmul.f32 %v529_v41, %v412_v8 }
 0x224   :  { %v547_v10 = vpop.eup %546 }
 0x225   :  { %429 = vst.msk [vmem:[%s718_s5] sm:$0xff] %vm428_vm2, %v420_v9  ;;  %v397_v11 = vmul.f32 %v547_v10, %v375_v6 }
 0x227   :  { %v405_v12 = vsub.f32 2.0, %v397_v11 }
 0x229   :  { %v413_v13 = vmul.f32 %v547_v10, %v405_v12 }
 0x22b   :  { %v421_v14 = vmul.f32 %v531_v43, %v413_v13  ;;  %v377_v15 = vpop.xlane.xlu1 %376 }
 0x22c   :  { %548 = vrcp.f32 %v377_v15 }
 0x22d   :  { %430 = vst.msk [vmem:[%s718_s5 + $0x8] sm:$0xff] %vm428_vm2, %v421_v14 }
 0x232   :  { %v549_v16 = vpop.eup %548 }
 0x233   :  { %v398_v17 = vmul.f32 %v549_v16, %v377_v15  ;;  %v379_v18 = vpop.xlane.xlu2 %378 }
 0x234   :  { %550 = vrcp.f32 %v379_v18 }
 0x235   :  { %v406_v19 = vsub.f32 2.0, %v398_v17 }
 0x237   :  { %v414_v20 = vmul.f32 %v549_v16, %v406_v19 }
 0x239   :  { %v422_v21 = vmul.f32 %v533_v49, %v414_v20 }
 0x23a   :  { %v551_v22 = vpop.eup %550 }
 0x23b   :  { %431 = vst.msk [vmem:[%s718_s5 + $0x10] sm:$0xff] %vm428_vm2, %v422_v21  ;;  %v399_v23 = vmul.f32 %v551_v22, %v379_v18  ;;  %v381_v25 = vpop.xlane.xlu0 %380 }
 0x23c   :  { %552 = vrcp.f32 %v381_v25 }
 0x23d   :  { %v407_v26 = vsub.f32 2.0, %v399_v23 }
 0x23f   :  { %v415_v27 = vmul.f32 %v551_v22, %v407_v26 }
 0x241   :  { %v423_v28 = vmul.f32 %v535_v53, %v415_v27 }
 0x242   :  { %v553_v29 = vpop.eup %552 }
 0x243   :  { %432 = vst.msk [vmem:[%s718_s5 + $0x18] sm:$0xff] %vm428_vm2, %v423_v28  ;;  %v400_v30 = vmul.f32 %v553_v29, %v381_v25  ;;  %v383_v31 = vpop.xlane.xlu1 %382 }
 0x244   :  { %554 = vrcp.f32 %v383_v31 }
 0x245   :  { %v408_v32 = vsub.f32 2.0, %v400_v30 }
 0x247   :  { %v416_v33 = vmul.f32 %v553_v29, %v408_v32 }
 0x249   :  { %v424_v34 = vmul.f32 %v537_v56, %v416_v33 }
 0x24a   :  { %v555_v35 = vpop.eup %554 }
 0x24b   :  { %433 = vst.msk [vmem:[%s718_s5 + $0x20] sm:$0xff] %vm428_vm2, %v424_v34  ;;  %v401_v36 = vmul.f32 %v555_v35, %v383_v31  ;;  %v385_v37 = vpop.xlane.xlu2 %384 }
 0x24c   :  { %556 = vrcp.f32 %v385_v37 }
 0x24d   :  { %v409_v38 = vsub.f32 2.0, %v401_v36 }
 0x24f   :  { %v417_v39 = vmul.f32 %v555_v35, %v409_v38 }
 0x251   :  { %v425_v40 = vmul.f32 %v539_v60, %v417_v39 }
 0x252   :  { %v557_v41 = vpop.eup %556 }
 0x253   :  { %434 = vst.msk [vmem:[%s718_s5 + $0x28] sm:$0xff] %vm428_vm2, %v425_v40  ;;  %v402_v42 = vmul.f32 %v557_v41, %v385_v37  ;;  %v387_v43 = vpop.xlane.xlu0 %386 }
 0x254   :  { %558 = vrcp.f32 %v387_v43 }
 0x255   :  { %v410_v44 = vsub.f32 2.0, %v402_v42 }
 0x257   :  { %v418_v45 = vmul.f32 %v557_v41, %v410_v44 }
 0x259   :  { %v426_v46 = vmul.f32 %v673_v0, %v418_v45 }
 0x25a   :  { %v559_v47 = vpop.eup %558 }
 0x25b   :  { %435 = vst.msk [vmem:[%s718_s5 + $0x30] sm:$0xff] %vm428_vm2, %v426_v46  ;;  %v403_v48 = vmul.f32 %v559_v47, %v387_v43 }
 0x25d   :  { %v411_v49 = vsub.f32 2.0, %v403_v48 }
 0x25f   :  { %v419_v50 = vmul.f32 %v559_v47, %v411_v49 }
 0x261   :  { %v427_v51 = vmul.f32 %v676_v2, %v419_v50 }
 0x263   :  { %436 = vst.msk [vmem:[%s718_s5 + $0x38] sm:$0xff] %vm428_vm2, %v427_v51 }
 0x264   :  { %441 = vsyncpa [#allocation3], 1 }

</bundles_post_ra>
